<compile_context>
chip_gen: v5e
topology: v5e:2x2
jax: 0.10.0
libtpu: 0.0.40
codegen_flags: <defaults>
</compile_context>

<pallas_src>
import functools

import jax
import jax.numpy as jnp
from jax import lax
from jax.experimental import pallas as pl
from jax.experimental.pallas import tpu as pltpu


def _round_up(v, m):
    return (v + m - 1) // m * m


# ---------------------------------------------------------------------------
# Kernel: streaming weighted reduction  sum(x2d * t_row)  with a persistent
# (1,1) f32 VMEM accumulator (init at first grid step, finalize at last step).
# Both grid axes feed the same accumulator -> "arbitrary" semantics.
# ---------------------------------------------------------------------------
def _weighted_sum_kernel(x_ref, t_ref, o_ref, acc_ref, *, scale,
                         n_rows, n_cols, row_mask, col_mask):
    i = pl.program_id(0)
    j = pl.program_id(1)
    first = jnp.logical_and(i == 0, j == 0)
    last = jnp.logical_and(i == pl.num_programs(0) - 1,
                           j == pl.num_programs(1) - 1)

    @pl.when(first)
    def _init():
        acc_ref[...] = jnp.zeros_like(acc_ref)

    tm, td = x_ref.shape
    # (TM, TD) * (1, TD) broadcast multiply (VPU); f32 accumulate.
    p = x_ref[...] * t_ref[...]

    # Edge-tile masking: only traced in when n/d are not tile-aligned, so the
    # aligned fast path pays nothing.  Masking the *product* is NaN-safe even if
    # the out-of-bounds part of the VMEM block contains garbage.
    if row_mask or col_mask:
        mask = None
        if row_mask:
            rid = lax.broadcasted_iota(jnp.int32, (tm, td), 0) + i * tm
            mask = rid < n_rows
        if col_mask:
            cid = lax.broadcasted_iota(jnp.int32, (tm, td), 1) + j * td
            cm = cid < n_cols
            mask = cm if mask is None else jnp.logical_and(mask, cm)
        p = jnp.where(mask, p, 0.0)

    acc_ref[...] += jnp.sum(p, keepdims=True)

    @pl.when(last)
    def _fini():
        o_ref[...] = acc_ref[...] * scale


def conv_transpose_mul_gap_mean(x, weight, bias, *, stride, padding,
                                output_padding, multiplier):
    """x: (N, Cin, H, W) f32; weight: (Cin, Cout, K, K) (PyTorch ConvTranspose2d layout);
    bias: (Cout,).  Returns a scalar f32 identical to ModelNew.forward(x)."""
    n, cin, h, w = x.shape
    _, cout, kh, kw = weight.shape
    h_out = (h - 1) * stride - 2 * padding + kh + output_padding
    w_out = (w - 1) * stride - 2 * padding + kw + output_padding

    # --- tiny glue: effective per-input-position weight map T (Cin, H, W) ---
    oh = jnp.arange(h)[:, None] * stride - padding + jnp.arange(kh)[None, :]   # (H, KH)
    ow = jnp.arange(w)[:, None] * stride - padding + jnp.arange(kw)[None, :]   # (W, KW)
    ih = ((oh >= 0) & (oh < h_out)).astype(jnp.float32)                        # (H, KH)
    iw = ((ow >= 0) & (ow < w_out)).astype(jnp.float32)                        # (W, KW)
    wsum = jnp.sum(weight.astype(jnp.float32), axis=1)                         # (Cin, KH, KW)
    t = jnp.einsum('hk,wl,ckl->chw', ih, iw, wsum)                             # (Cin, H, W)

    # --- lane-dense layout for the streamed data: (N, Cin*H*W), last dim -> x128 ---
    d = cin * h * w
    x2d = x.reshape(n, d).astype(jnp.float32)       # free reshape (NCHW contiguous)
    t2d = t.reshape(1, d)

    # Column (lane) tile: multiple of 128 (or the full dim when d < 128).
    if d % 128 == 0:
        td = next(c for c in (4096, 2048, 1024, 512, 256, 128) if d % c == 0)
    elif d < 128:
        td = d
    else:
        td = min(4096, (d // 128) * 128)

    # Row (sublane) tile: multiple of 8 or the full dim.
    if n % 8 == 0:
        tm = min(256, n)
    elif n <= 1024:
        tm = n
    else:
        tm = 256

    # VMEM budget: keep the double-buffered x tile small (<= ~8 MiB total),
    # safe under the default scoped VMEM limit on v5e/v6e/v7x.
    while tm * td * 4 > (4 << 20) and td > 128 and td % 256 == 0:
        td //= 2

    row_mask = (tm != n) and (n % tm != 0)
    col_mask = (td != d) and (d % td != 0)

    grid = (pl.cdiv(n, tm), pl.cdiv(d, td))

    # Pad only the tiny T row so its blocks are always fully in-bounds (zeros).
    d_ceil = grid[1] * td
    if d_ceil != d:
        t2d = jnp.pad(t2d, ((0, 0), (0, d_ceil - d)))

    scale = float(multiplier) / float(n * cout * h_out * w_out)

    # TODO(synk): on v7x the row-tile axis could be split across the 2 TensorCores
    # with per-core partial accumulators; single-TC reduction kept here (mem-bound).
    out = pl.pallas_call(
        functools.partial(_weighted_sum_kernel, scale=scale, n_rows=n, n_cols=d,
                          row_mask=row_mask, col_mask=col_mask),
        out_shape=jax.ShapeDtypeStruct((1, 1), jnp.float32),
        grid_spec=pltpu.PrefetchScalarGridSpec(
            num_scalar_prefetch=0,
            grid=grid,
            in_specs=[pl.BlockSpec((tm, td), lambda i, j: (i, j)),
                      pl.BlockSpec((1, td), lambda i, j: (0, j))],
            out_specs=pl.BlockSpec((1, 1), lambda i, j: (0, 0)),
            scratch_shapes=[pltpu.VMEM((1, 1), jnp.float32)]),
        compiler_params=pltpu.CompilerParams(
            dimension_semantics=("arbitrary", "arbitrary")),
        cost_estimate=pl.CostEstimate(flops=2 * n * d, transcendentals=0,
                                      bytes_accessed=(n * d + d + 1) * 4),
    )(x2d, t2d)

    # Analytic bias term: bias adds bias[c] to every output element, so after the
    # multiplier and the full mean it contributes exactly multiplier * mean(bias).
    return out[0, 0] + jnp.float32(multiplier) * jnp.mean(bias.astype(jnp.float32))


def _reference(x, weight, bias, *, stride, padding, output_padding, multiplier):
    """Pure-JAX reference of the full PyTorch forward (sanity check)."""
    cin, cout, kh, kw = weight.shape
    w_conv = weight.transpose(1, 0, 2, 3)[:, :, ::-1, ::-1]  # (Cout, Cin, K, K), flipped
    y = lax.conv_general_dilated(
        x, w_conv, window_strides=(1, 1),
        padding=[(kh - 1 - padding, kh - 1 - padding + output_padding),
                 (kw - 1 - padding, kw - 1 - padding + output_padding)],
        lhs_dilation=(stride, stride),
        dimension_numbers=("NCHW", "OIHW", "NCHW"),
    ) + bias.reshape(1, -1, 1, 1)
    return jnp.mean(y * multiplier)


if __name__ == "__main__":
    # Small shapes consistent with the module's forward.
    N, Cin, Cout, K = 2, 4, 8, 3
    H = W = 16
    stride, padding, output_padding = 2, 1, 1
    multiplier = 0.5

    key = jax.random.PRNGKey(0)
    kx, kw_, kb = jax.random.split(key, 3)
    x = jax.random.normal(kx, (N, Cin, H, W), dtype=jnp.float32)
    weight = jax.random.normal(kw_, (Cin, Cout, K, K), dtype=jnp.float32) * 0.1
    bias = jax.random.normal(kb, (Cout,), dtype=jnp.float32) * 0.1

    fwd = jax.jit(functools.partial(
        conv_transpose_mul_gap_mean, stride=stride, padding=padding,
        output_padding=output_padding, multiplier=multiplier))

    out = fwd(x, weight, bias)
    out = jax.block_until_ready(out)

    ref = _reference(x, weight, bias, stride=stride, padding=padding,
                     output_padding=output_padding, multiplier=multiplier)
    assert jnp.allclose(out, ref, rtol=1e-4, atol=1e-5), (out, ref)

    print("KERNEL_OK")
</pallas_src>

<mosaic_0001>
module attributes {stable_mosaic.version = 11 : i64} {
  func.func @_weighted_sum_kernel(%arg0: i32, %arg1: i32, %arg2: memref<2x1024xf32, #tpu.memory_space<vmem>>, %arg3: memref<1x1024xf32, #tpu.memory_space<vmem>>, %arg4: memref<1x1xf32, #tpu.memory_space<vmem>>, %arg5: memref<1x1xf32, #tpu.memory_space<vmem>>) attributes {dimension_semantics = [#tpu.dimension_semantics<arbitrary>, #tpu.dimension_semantics<arbitrary>], iteration_bounds = array<i64: 1, 1>, scalar_prefetch = 0 : i64, scratch_operands = 1 : i64, tpu.core_type = #tpu.core_type<tc>, window_params = [{transform_indices = @transform_0, window_bounds = array<i64: 2, 1024>}, {transform_indices = @transform_1, window_bounds = array<i64: 1, 1024>}, {pipeline_mode = #tpu.pipeline_mode<synchronous>, transform_indices = @transform_2, window_bounds = array<i64: 1, 1>}]} {
    %c0_i32 = arith.constant 0 : i32
    %0 = arith.cmpi eq, %arg0, %c0_i32 : i32
    %c0_i32_0 = arith.constant 0 : i32
    %1 = arith.cmpi eq, %arg1, %c0_i32_0 : i32
    %2 = arith.andi %0, %1 : i1
    %c0_i32_1 = arith.constant 0 : i32
    %3 = arith.cmpi eq, %arg0, %c0_i32_1 : i32
    %c0_i32_2 = arith.constant 0 : i32
    %4 = arith.cmpi eq, %arg1, %c0_i32_2 : i32
    %5 = arith.andi %3, %4 : i1
    %6 = arith.extui %2 : i1 to i32
    %c0_i32_3 = arith.constant 0 : i32
    %7 = arith.cmpi ne, %6, %c0_i32_3 : i32
    scf.if %7 {
      %cst_12 = arith.constant 0.000000e+00 : f32
      %22 = vector.broadcast %cst_12 : f32 to vector<1x1xf32>
      %c0_13 = arith.constant 0 : index
      %c0_14 = arith.constant 0 : index
      %23 = vector.load %arg5[%c0_13, %c0_14] : memref<1x1xf32, #tpu.memory_space<vmem>>, vector<1x1xf32>
      tpu.vector_store %arg5[%c0_13, %c0_14], %22 {strides = array<i32>} : memref<1x1xf32, #tpu.memory_space<vmem>>, vector<1x1xf32>,
    } else {
    }
    %c0 = arith.constant 0 : index
    %c0_4 = arith.constant 0 : index
    %8 = vector.load %arg2[%c0, %c0_4] : memref<2x1024xf32, #tpu.memory_space<vmem>>, vector<2x1024xf32>
    %c0_5 = arith.constant 0 : index
    %c0_6 = arith.constant 0 : index
    %9 = vector.load %arg3[%c0_5, %c0_6] : memref<1x1024xf32, #tpu.memory_space<vmem>>, vector<1x1024xf32>
    %10 = vector.broadcast %9 : vector<1x1024xf32> to vector<2x1024xf32>
    %11 = arith.mulf %8, %10 : vector<2x1024xf32>
    %c0_7 = arith.constant 0 : index
    %c0_8 = arith.constant 0 : index
    %12 = vector.load %arg5[%c0_7, %c0_8] : memref<1x1xf32, #tpu.memory_space<vmem>>, vector<1x1xf32>
    %13 = vector.shape_cast %11 : vector<2x1024xf32> to vector<1x2x1024xf32>
    %cst = arith.constant dense<0.000000e+00> : vector<1xf32>
    %14 = vector.multi_reduction <add>, %13, %cst [1, 2] : vector<1x2x1024xf32> to vector<1xf32>
    %15 = vector.shape_cast %14 : vector<1xf32> to vector<1x1x1xf32>
    %16 = vector.extract %15[0, 0, 0] : f32 from vector<1x1x1xf32>
    %17 = vector.broadcast %16 : f32 to vector<1x1xf32>
    %18 = arith.addf %12, %17 : vector<1x1xf32>
    %c0_9 = arith.constant 0 : index
    %c0_10 = arith.constant 0 : index
    %19 = vector.load %arg5[%c0_9, %c0_10] : memref<1x1xf32, #tpu.memory_space<vmem>>, vector<1x1xf32>
    tpu.vector_store %arg5[%c0_9, %c0_10], %18 {strides = array<i32>} : memref<1x1xf32, #tpu.memory_space<vmem>>, vector<1x1xf32>,
    %20 = arith.extui %5 : i1 to i32
    %c0_i32_11 = arith.constant 0 : i32
    %21 = arith.cmpi ne, %20, %c0_i32_11 : i32
    scf.if %21 {
      %c0_12 = arith.constant 0 : index
      %c0_13 = arith.constant 0 : index
      %22 = vector.load %arg5[%c0_12, %c0_13] : memref<1x1xf32, #tpu.memory_space<vmem>>, vector<1x1xf32>
      %cst_14 = arith.constant 3.05175781E-5 : f32
      %23 = vector.broadcast %cst_14 : f32 to vector<1x1xf32>
      %24 = arith.mulf %22, %23 : vector<1x1xf32>
      %c0_15 = arith.constant 0 : index
      %c0_16 = arith.constant 0 : index
      %25 = vector.load %arg4[%c0_15, %c0_16] : memref<1x1xf32, #tpu.memory_space<vmem>>, vector<1x1xf32>
      tpu.vector_store %arg4[%c0_15, %c0_16], %24 {strides = array<i32>} : memref<1x1xf32, #tpu.memory_space<vmem>>, vector<1x1xf32>,
    } else {
    }
    return
  }
  func.func @transform_0(%arg0: i32, %arg1: i32) -> (i32, i32) {
    %c0_i32 = arith.constant 0 : i32
    return %arg0, %arg1 : i32, i32
  }
  func.func @transform_1(%arg0: i32, %arg1: i32) -> (i32, i32) {
    %c0_i32 = arith.constant 0 : i32
    %c0_i32_0 = arith.constant 0 : i32
    return %c0_i32, %arg1 : i32, i32
  }
  func.func @transform_2(%arg0: i32, %arg1: i32) -> (i32, i32) {
    %c0_i32 = arith.constant 0 : i32
    %c0_i32_0 = arith.constant 0 : i32
    %c0_i32_1 = arith.constant 0 : i32
    return %c0_i32, %c0_i32_0 : i32, i32
  }
}

</mosaic_0001>

<bundles_post_ra>
// kernel: conv_transpose_mul_gap_mean.1
= control target key start
LH: loop header
LB: loop body
LE: loop exit
PB: predicated region body
PF: predicated region fallthrough
CT: control target
= control target key end

     0   :  { %vm38_vm0 = vcmask 1041408   ;;  %vm40_vm1 = vcmask 1045508   ;;  %s196_s0 = inlined_call_operand.vmem [shape: f32[2,1024], index: 0, kind: input, shape index: {}]   ;;  %s197_s1 = inlined_call_operand.vmem [shape: f32[1,1024], index: 1, kind: input, shape index: {}]   ;;  %s198_s2 = inlined_call_operand.hbm [shape: f32[1,1], index: 2, kind: output, shape index: {}]  }
   0x1   :  { %v22_v0 = vld [vmem:[%s197_s1] sm:$0xff] }
   0x2   :  { %v24_v1 = vperm.slane %v22_v0, 0  ;;  %v25_v2 = vperm.slane %v22_v0, 1  ;;  %v26_v3 = vperm.slane %v22_v0, 2  ;;  %v27_v4 = vperm.slane %v22_v0, 3 }
   0x3   :  { %7 = vsyncpa [#allocation4], 0  ;;  %v28_v5 = vperm.slane %v22_v0, 4  ;;  %v29_v6 = vperm.slane %v22_v0, 5  ;;  %v30_v7 = vperm.slane %v22_v0, 6  ;;  %v31_v8 = vperm.slane %v22_v0, 7 }
   0x4   :  { %v32_v9 = vrot.slane %v25_v2, 6  ;;  %v33_v10 = vrot.slane %v26_v3, 4  ;;  %v34_v11 = vrot.slane %v27_v4, 2  ;;  %vm42_vm2 = vcmask 1043456   ;;  %v20_v12 = vld [vmem:[%s196_s0] sm:$0xff]  ;;  %v21_v16 = vld [vmem:[%s196_s0 + $0x8] sm:$0xff] }
   0x5   :  { %v35_v13 = vrot.slane %v29_v6, 6  ;;  %v36_v14 = vrot.slane %v30_v7, 4  ;;  %v37_v15 = vrot.slane %v31_v8, 2  ;;  %vm18_vm3 = vcmask 0   ;;  %s153_s14 = smov [#allocation3]   ;;  %s113_s18 = sshll.u32 %s198_s2, 4  ;;  %s114_s18 = int_to_ptr.hbm [resolvable:$true] %s113_s18 }
   0x6   :  { %v39_v17 = vsel %vm38_vm0, %v24_v1, %v32_v9  ;;  %v41_v18 = vsel %vm40_vm1, %v33_v10, %v34_v11  ;;  %v152_v48 = vmov 0.0   ;;  %s111_s15 = sshll.u32 %s153_s14, 4  ;;  %s112_s15 = int_to_ptr.vmem [resolvable:$true] %s111_s15 }
   0x7   :  { %v43_v19 = vsel %vm42_vm2, %v39_v17, %v41_v18  ;;  %v44_v20 = vsel %vm38_vm0, %v28_v5, %v35_v13  ;;  %v45_v21 = vsel %vm40_vm1, %v36_v14, %v37_v15  ;;  %19 = vst.msk [vmem:[#allocation2] sm:$0x1] %vm18_vm3, %v152_v48 }
   0x8   :  { %v46_v22 = vsel %vm42_vm2, %v44_v20, %v45_v21  ;;  %v49_v23 = vmul.f32 %v43_v19, %v20_v12 }
   0x9   :  { %v50_v24 = vmul.f32 %v46_v22, %v21_v16 }
   0xa   :  { %54 = vst [vmem:[#allocation1] ss:$4 sm:$0xff] %v49_v23 }
   0xb   :  { %56 = vst [vmem:[#allocation1 + $0x20] ss:$4 sm:$0xff] %v50_v24 }
   0xe   :  { %v51_v56 = vld [vmem:[#allocation2] sm:$0x1] }
  0x11   :  { %v57_v25 = vld.sshfl [vmem:[#allocation1] sm:$0xff pattern:$0x73625140]  ;;  %v58_v26 = vld.sshfl [vmem:[#allocation1 + $0x8] sm:$0xff pattern:$0x73625140] }
  0x12   :  { %v59_v27 = vld.sshfl [vmem:[#allocation1 + $0x10] sm:$0xff pattern:$0x73625140]  ;;  %v60_v28 = vld.sshfl [vmem:[#allocation1 + $0x18] sm:$0xff pattern:$0x73625140] }
  0x13   :  { %v73_v29 = vsel %vm38_vm0, %v57_v25, 0.0  ;;  %v74_v30 = vsel %vm38_vm0, %v58_v26, 0.0  ;;  %v76_v31 = vsel %vm38_vm0, %v59_v27, 0.0  ;;  %v61_v32 = vld.sshfl [vmem:[#allocation1 + $0x20] sm:$0xff pattern:$0x73625140] }
  0x14   :  { %v75_v33 = vadd.f32 %v74_v30, %v73_v29  ;;  %v78_v34 = vsel %vm38_vm0, %v60_v28, 0.0  ;;  %v62_v35 = vld.sshfl [vmem:[#allocation1 + $0x28] sm:$0xff pattern:$0x73625140]  ;;  %v80_v37 = vsel %vm38_vm0, %v61_v32, 0.0 }
  0x15   :  { %v63_v38 = vld.sshfl [vmem:[#allocation1 + $0x30] sm:$0xff pattern:$0x73625140]  ;;  %v82_v40 = vsel %vm38_vm0, %v62_v35, 0.0 }
  0x16   :  { %v77_v36 = vadd.f32 %v76_v31, %v75_v33  ;;  %v64_v41 = vld.sshfl [vmem:[#allocation1 + $0x38] sm:$0xff pattern:$0x73625140]  ;;  %v84_v43 = vsel %vm38_vm0, %v63_v38, 0.0 }
  0x17   :  { %v86_v45 = vsel %vm38_vm0, %v64_v41, 0.0 }
  0x18   :  { %v79_v39 = vadd.f32 %v78_v34, %v77_v36 }
  0x1a   :  { %v81_v42 = vadd.f32 %v80_v37, %v79_v39 }
  0x1c   :  { %v83_v44 = vadd.f32 %v82_v40, %v81_v42 }
  0x1e   :  { %v85_v46 = vadd.f32 %v84_v43, %v83_v44 }
  0x20   :  { %v87_v47 = vadd.f32 %v86_v45, %v85_v46 }
  0x22   :  { %88 = vadd.xlane.f32.xlu0 %v87_v47 }
  0x95   :  { %v89_v49 = vpop.xlane.xlu0 %88 }
  0x96   :  { %v90_v50 = vrot.slane %v89_v49, 4 }
  0x98   :  { %v91_v51 = vadd.f32 %v90_v50, %v89_v49 }
  0x9a   :  { %v92_v52 = vrot.slane %v91_v51, 2 }
  0x9c   :  { %v93_v53 = vadd.f32 %v92_v52, %v91_v51 }
  0x9e   :  { %v94_v54 = vrot.slane %v93_v53, 1 }
  0xa0   :  { %v95_v55 = vadd.f32 %v94_v54, %v93_v53 }
  0xa2   :  { %122 = vpush %v95_v55 }
  0xd3   :  { %s123_s0 = spop %122 }
  0xd4   :  { %v97_v57 = vstv %s123_s0 }
  0xd5   :  { %v98_v58 = vadd.f32 %v97_v57, %v51_v56 }
  0xd7   :  { %100 = vst.msk [vmem:[#allocation2] sm:$0x1] %vm18_vm3, %v98_v58 }
  0xde   :  { %v103_v59 = vld [vmem:[#allocation2] sm:$0x1] }
  0xdf   :  { %v104_v60 = vmul.f32 3.0517578e-05, %v103_v59 }
  0xe1   :  { %105 = vst.msk [vmem:[#allocation3] sm:$0x1] %vm18_vm3, %v104_v60 }
  0xe2   :  { %116 = dma.vmem_to_hbm [thread:$0]  %s112_s15, 16, %s114_s18, [#allocation4]  }
  0xe3   :  { %150 = dma.done.wait [#allocation4], 16  }
  0xe4   :  { %151 = vsyncadd [#allocation4], 4294967280 }
  0xe5   :  { %121 = vsyncpa [#allocation4], 1 }

</bundles_post_ra>
